<compile_context>
chip_gen: v7x
topology: tpu7x:2x2x1
jax: 0.10.0
libtpu: 0.0.40
codegen_flags: <defaults>
</compile_context>

<pallas_src>
import jax
import jax.numpy as jnp
from jax import lax
from jax.experimental import pallas as pl
from jax.experimental.pallas import tpu as pltpu

P = 128  # padded lane width; also the row-block size inside the constant slab


def fixed_hidden_mlp_kernel(x_ref, slab_ref, out_ref):
    """3 matmuls + relu + exact halving-scale + fused final sums, one tile.

    x_ref   : [B, 20]   VMEM  (activations)
    slab_ref: [264, 128] VMEM (packed constants, zero-padded; see pack_params)
    out_ref : [1, 1]    SMEM  (scalar result)
    """
    x = x_ref[...]                       # [B, D]
    B, D = x.shape                       # static

    wt = slab_ref[0:P, :]                # [128, 128] W^T, zero outside [0:D, 0:D]
    rw = slab_ref[P:2 * P, :]            # [128, 128] rand_weight, zero-padded
    b = slab_ref[2 * P:2 * P + 1, :]     # [1, 128]   bias, zero outside [0:D]

    # h1 = linear(x): contract x's D features against the top D rows of W^T.
    # Padded lanes D:128 of h1 are exactly 0 (zero W^T columns, zero bias pad).
    h = jnp.dot(x, wt[:D, :], preferred_element_type=jnp.float32) + b        # [B, 128]
    # h2 = relu(h1 @ rand_weight + 1): padded lanes become relu(0 + 1) = 1,
    # but they only ever multiply the zero rows D:128 of W^T next -> harmless.
    h = jnp.maximum(jnp.dot(h, rw, preferred_element_type=jnp.float32) + 1.0, 0.0)
    # h3 = linear(h2): padded lanes return to exactly 0.
    h = jnp.dot(h, wt, preferred_element_type=jnp.float32) + b               # [B, 128]

    # Fused epilogue reductions: one cross-lane reduce over a single vreg
    # holding [h ; |h|], then split into the two scalars.
    stacked = jnp.concatenate([h, jnp.abs(h)], axis=0)                       # [2B, 128]
    partial = jnp.sum(stacked, axis=1, keepdims=True)                        # [2B, 1]
    total = jnp.sum(partial[:B, :])
    abs_sum = jnp.sum(partial[B:, :])

    # while |h|.sum() > 1: h /= 2 ; return h.sum()
    # Halving is an exact power-of-two scaling in fp32, so the loop equals:
    # smallest k >= 0 with abs_sum * 2**-k <= 1, then total * 2**-k.  k is
    # read off abs_sum's exponent bits (bit-exact at power-of-two boundaries,
    # unlike float log2/ceil).  NaN -> k = 0, matching the reference's
    # immediate exit.  Notes: iterated halving could differ by ~1 ulp only if
    # elements of h crossed the subnormal range (unreachable for these
    # U(0,1)-scale inputs), and the exponent-field assembly of `scale` assumes
    # abs_sum < 2**126 (always true here; abs_sum = +inf would make the
    # reference loop forever anyway).
    bits = lax.bitcast_convert_type(abs_sum, jnp.int32)
    biased_exp = jnp.right_shift(bits, 23) & 0xFF        # abs_sum >= 0 -> sign bit 0
    mantissa = bits & 0x7FFFFF
    # abs_sum = m * 2**e with m in [1, 2):  k = e if m == 1 else e + 1
    k = (biased_exp - 127) + (mantissa != 0).astype(jnp.int32)
    k = jnp.where(abs_sum > 1.0, k, 0)
    scale = lax.bitcast_convert_type((127 - k) << 23, jnp.float32)   # exact 2**-k

    out_ref[0, 0] = total * scale


def pack_params(w_lin, b_lin, rand_weight):
    """Build the packed constant slab ONCE at init time (not per call).

    Layout, f32[264, 128], zeros everywhere not listed:
      rows   0:128 -> W_lin^T ([in, out])  in [0:D, 0:D]
      rows 128:256 -> rand_weight          in [0:D, 0:D]
      row      256 -> bias                 in [0:D]
      rows 257:264 -> zero padding (sublane alignment)
    The zero rows/lanes are load-bearing: they make the padded 128-lane matmul
    chain bit-identical to the 20-wide reference math.
    """
    D = w_lin.shape[0]
    wt_pad = jnp.zeros((P, P), jnp.float32).at[:D, :D].set(w_lin.T.astype(jnp.float32))
    rw_pad = jnp.zeros((P, P), jnp.float32).at[:D, :D].set(rand_weight.astype(jnp.float32))
    b_pad = jnp.zeros((8, P), jnp.float32).at[0, :D].set(b_lin.astype(jnp.float32))
    return jnp.concatenate([wt_pad, rw_pad, b_pad], axis=0)          # [264, 128]


def fixed_hidden_mlp(x, slab):
    out = pl.pallas_call(
        fixed_hidden_mlp_kernel,
        out_shape=jax.ShapeDtypeStruct((1, 1), jnp.float32),
        in_specs=[
            pl.BlockSpec(memory_space=pltpu.MemorySpace.VMEM),
            pl.BlockSpec(memory_space=pltpu.MemorySpace.VMEM),
        ],
        out_specs=pl.BlockSpec(memory_space=pltpu.MemorySpace.SMEM),
    )(x, slab)
    return out[0, 0]


def reference(x, w_lin, b_lin, rand_weight):
    # Pure-JAX reference (also serves as the fused-XLA, no-Pallas baseline).
    h = x @ w_lin.T + b_lin
    h = jnp.maximum(h @ rand_weight + 1.0, 0.0)
    h = h @ w_lin.T + b_lin

    def cond(hh):
        return jnp.sum(jnp.abs(hh)) > 1.0

    def body(hh):
        return hh / 2.0

    h = lax.while_loop(cond, body, h)
    return jnp.sum(h)


if __name__ == "__main__":
    key = jax.random.PRNGKey(0)
    kx, kw, kb, kr = jax.random.split(key, 4)

    B, D = 2, 20
    x = jax.random.uniform(kx, (B, D), dtype=jnp.float32)            # torch.rand(2, 20)
    # nn.Linear(20, 20): weight/bias ~ U(-1/sqrt(20), 1/sqrt(20))
    bound = 1.0 / jnp.sqrt(jnp.float32(D))
    w_lin = jax.random.uniform(kw, (D, D), dtype=jnp.float32, minval=-bound, maxval=bound)
    b_lin = jax.random.uniform(kb, (D,), dtype=jnp.float32, minval=-bound, maxval=bound)
    # rand_weight ~ U(0, 1), fixed (non-trainable)
    rand_weight = jax.random.uniform(kr, (D, D), dtype=jnp.float32)

    # Init-time packing: transpose + padding hoisted out of the per-call path.
    slab = jax.block_until_ready(pack_params(w_lin, b_lin, rand_weight))

    run = jax.jit(fixed_hidden_mlp)
    out = jax.block_until_ready(run(x, slab))

    ref = jax.block_until_ready(reference(x, w_lin, b_lin, rand_weight))
    assert jnp.allclose(out, ref, rtol=1e-5, atol=1e-5), (out, ref)

    print("KERNEL_OK")
</pallas_src>

<mosaic_0001>
module attributes {stable_mosaic.version = 11 : i64} {
  func.func @fixed_hidden_mlp_kernel(%arg0: memref<2x20xf32, #tpu.memory_space<vmem>>, %arg1: memref<264x128xf32, #tpu.memory_space<vmem>>, %arg2: memref<1x1xf32, #tpu.memory_space<smem>>) attributes {dimension_semantics = [], scalar_prefetch = 0 : i64, scratch_operands = 0 : i64, tpu.core_type = #tpu.core_type<tc>} {
    %c0 = arith.constant 0 : index
    %c0_0 = arith.constant 0 : index
    %0 = vector.load %arg0[%c0, %c0_0] : memref<2x20xf32, #tpu.memory_space<vmem>>, vector<2x20xf32>
    %c0_1 = arith.constant 0 : index
    %c0_2 = arith.constant 0 : index
    %1 = vector.load %arg1[%c0_1, %c0_2] : memref<264x128xf32, #tpu.memory_space<vmem>>, vector<128x128xf32>
    %c128 = arith.constant 128 : index
    %c0_3 = arith.constant 0 : index
    %2 = vector.load %arg1[%c128, %c0_3] : memref<264x128xf32, #tpu.memory_space<vmem>>, vector<128x128xf32>
    %c256 = arith.constant 256 : index
    %c0_4 = arith.constant 0 : index
    %3 = vector.load %arg1[%c256, %c0_4] : memref<264x128xf32, #tpu.memory_space<vmem>>, vector<1x128xf32>
    %4 = vector.extract_strided_slice %1 {offsets = [0, 0], sizes = [20, 128], strides = [1, 1]} : vector<128x128xf32> to vector<20x128xf32>
    %cst = arith.constant dense<0.000000e+00> : vector<2x128xf32>
    %5 = tpu.matmul %0, %4, %cst {dimension_numbers = #tpu.dot_dimension_numbers<[1], [0], [0], [1], [0, 0, 1, 1], [], []>} : vector<2x20xf32>, vector<20x128xf32>, vector<2x128xf32> -> vector<2x128xf32>
    %6 = vector.broadcast %3 : vector<1x128xf32> to vector<2x128xf32>
    %7 = arith.addf %5, %6 : vector<2x128xf32>
    %cst_5 = arith.constant dense<0.000000e+00> : vector<2x128xf32>
    %8 = tpu.matmul %7, %2, %cst_5 {dimension_numbers = #tpu.dot_dimension_numbers<[1], [0], [0], [1], [0, 0, 1, 1], [], []>} : vector<2x128xf32>, vector<128x128xf32>, vector<2x128xf32> -> vector<2x128xf32>
    %cst_6 = arith.constant 1.000000e+00 : f32
    %9 = vector.broadcast %cst_6 : f32 to vector<2x128xf32>
    %10 = arith.addf %8, %9 : vector<2x128xf32>
    %cst_7 = arith.constant 0.000000e+00 : f32
    %11 = vector.broadcast %cst_7 : f32 to vector<2x128xf32>
    %12 = arith.maximumf %10, %11 : vector<2x128xf32>
    %cst_8 = arith.constant dense<0.000000e+00> : vector<2x128xf32>
    %13 = tpu.matmul %12, %1, %cst_8 {dimension_numbers = #tpu.dot_dimension_numbers<[1], [0], [0], [1], [0, 0, 1, 1], [], []>} : vector<2x128xf32>, vector<128x128xf32>, vector<2x128xf32> -> vector<2x128xf32>
    %14 = vector.broadcast %3 : vector<1x128xf32> to vector<2x128xf32>
    %15 = arith.addf %13, %14 : vector<2x128xf32>
    %16 = math.absf %15 : vector<2x128xf32>
    %17 = tpu.concatenate %15, %16 in 0 : vector<2x128xf32>, vector<2x128xf32> -> vector<4x128xf32>
    %cst_9 = arith.constant dense<0.000000e+00> : vector<4xf32>
    %18 = vector.multi_reduction <add>, %17, %cst_9 [1] : vector<4x128xf32> to vector<4xf32>
    %19 = vector.shape_cast %18 : vector<4xf32> to vector<4x1xf32>
    %20 = vector.extract_strided_slice %19 {offsets = [0, 0], sizes = [2, 1], strides = [1, 1]} : vector<4x1xf32> to vector<2x1xf32>
    %21 = vector.shape_cast %20 : vector<2x1xf32> to vector<1x2x1xf32>
    %cst_10 = arith.constant dense<0.000000e+00> : vector<1xf32>
    %22 = vector.multi_reduction <add>, %21, %cst_10 [1, 2] : vector<1x2x1xf32> to vector<1xf32>
    %23 = vector.shape_cast %22 : vector<1xf32> to vector<1x1x1xf32>
    %24 = vector.extract %23[0, 0, 0] : f32 from vector<1x1x1xf32>
    %25 = vector.extract_strided_slice %19 {offsets = [2, 0], sizes = [2, 1], strides = [1, 1]} : vector<4x1xf32> to vector<2x1xf32>
    %26 = vector.shape_cast %25 : vector<2x1xf32> to vector<1x2x1xf32>
    %cst_11 = arith.constant dense<0.000000e+00> : vector<1xf32>
    %27 = vector.multi_reduction <add>, %26, %cst_11 [1, 2] : vector<1x2x1xf32> to vector<1xf32>
    %28 = vector.shape_cast %27 : vector<1xf32> to vector<1x1x1xf32>
    %29 = vector.extract %28[0, 0, 0] : f32 from vector<1x1x1xf32>
    %30 = arith.bitcast %29 : f32 to i32
    %c23_i32 = arith.constant 23 : i32
    %31 = arith.shrsi %30, %c23_i32 : i32
    %c255_i32 = arith.constant 255 : i32
    %32 = arith.andi %31, %c255_i32 : i32
    %c8388607_i32 = arith.constant 8388607 : i32
    %33 = arith.andi %30, %c8388607_i32 : i32
    %c127_i32 = arith.constant 127 : i32
    %34 = arith.subi %32, %c127_i32 : i32
    %c0_i32 = arith.constant 0 : i32
    %35 = arith.cmpi ne, %33, %c0_i32 : i32
    %36 = arith.extui %35 : i1 to i32
    %37 = arith.addi %34, %36 : i32
    %cst_12 = arith.constant 1.000000e+00 : f32
    %38 = arith.cmpf ogt, %29, %cst_12 : f32
    %c0_i32_13 = arith.constant 0 : i32
    %39 = arith.select %38, %37, %c0_i32_13 : i32
    %c127_i32_14 = arith.constant 127 : i32
    %40 = arith.subi %c127_i32_14, %39 : i32
    %c23_i32_15 = arith.constant 23 : i32
    %41 = arith.shli %40, %c23_i32_15 : i32
    %42 = arith.bitcast %41 : i32 to f32
    %43 = arith.mulf %24, %42 : f32
    %c0_16 = arith.constant 0 : index
    %c0_17 = arith.constant 0 : index
    %44 = memref.load %arg2[%c0_16, %c0_17] : memref<1x1xf32, #tpu.memory_space<smem>>
    memref.store %43, %arg2[%c0_16, %c0_17] : memref<1x1xf32, #tpu.memory_space<smem>>
    return
  }
}

</mosaic_0001>

<bundles_post_ra>
// kernel: fixed_hidden_mlp.1
= control target key start
LH: loop header
LB: loop body
LE: loop exit
PB: predicated region body
PF: predicated region fallthrough
CT: control target
= control target key end

     0   :  { %7 = vsyncpa [#allocation3], 0  ;;  %s691_s0 = inlined_call_operand.hbm [shape: f32[2,20], index: 0, kind: input, shape index: {}]   ;;  %s692_s1 = inlined_call_operand.hbm [shape: f32[264,128], index: 1, kind: input, shape index: {}]   ;;  %s693_s2 = inlined_call_operand.hbm [shape: f32[1,1], index: 2, kind: output, shape index: {}]  }
   0x1   :  { %8 = vsyncpa [#allocation6], 0 }
   0x2   :  { %9 = vsyncpa [#allocation4], 0  ;;  %s603_s9 = smov [#allocation2]   ;;  %s604_s11 = smov [#allocation5]  }
   0x3   :  { %s16_s10 = sshll.u32 %s603_s9, 4  ;;  %s25_s12 = sshll.u32 %s604_s11, 4  ;;  %s17_s10 = int_to_ptr.vmem [resolvable:$true] %s16_s10  ;;  %s626_s12 = int_to_ptr.vmem [resolvable:$true] %s25_s12 }
   0x4   :  { %s543_s15 = scalar_lea.hbm %s691_s0, 32 }
   0x5   :  { %p544_p0 = scmp.ne.s32.totalorder %s691_s0, %s543_s15  ;;  %p547_p1 = scmp.lt.u32.totalorder %s543_s15, %s691_s0 }
   0x7   :  { %p549_p2 = pnand %p547_p1, %p544_p0 }
   0x9   :  { %552 = shalt.err (!%p549_p2)
}
   0xa   :  { %s553_s20 = scalar_lea.vmem %s17_s10, 32  ;;  %p558_p4 = scmp.lt.s32.totalorder %s17_s10, %s17_s10 }
   0xb   :  { %p554_p3 = scmp.ne.s32.totalorder %s17_s10, %s553_s20  ;;  %p559_p5 = scmp.lt.s32.totalorder %s553_s20, %s553_s20 }
   0xd   :  { %p560_p6 = por %p559_p5, %p558_p4 }
   0xf   :  { %p561_p7 = pnand %p560_p6, %p554_p3 }
  0x11   :  { %564 = shalt.err (!%p561_p7)
}
  0x12   :  { %19 = dma.hbm_to_vmem [thread:$0]  %s691_s0, 32, %s17_s10, [#allocation3]  }
  0x13   :  { %s565_s25 = scalar_lea.hbm %s692_s1, 4224 }
  0x14   :  { %p566_p8 = scmp.ne.s32.totalorder %s692_s1, %s565_s25  ;;  %p569_p9 = scmp.lt.u32.totalorder %s565_s25, %s692_s1 }
  0x16   :  { %p571_p10 = pnand %p569_p9, %p566_p8 }
  0x18   :  { %574 = shalt.err (!%p571_p10)
}
  0x19   :  { %s575_s30 = scalar_lea.vmem %s626_s12, 4224  ;;  %p580_p12 = scmp.lt.s32.totalorder %s626_s12, %s626_s12 }
  0x1a   :  { %p576_p11 = scmp.ne.s32.totalorder %s626_s12, %s575_s30  ;;  %p581_p13 = scmp.lt.s32.totalorder %s575_s30, %s575_s30 }
  0x1c   :  { %p582_p0 = por %p581_p13, %p580_p12 }
  0x1e   :  { %p583_p1 = pnand %p582_p0, %p576_p11 }
  0x20   :  { %586 = shalt.err (!%p583_p1)
}
  0x21   :  { %s605_s0 = smov 128   ;;  %s606_s3 = smov 8  }
  0x22   :  { %31 = dma.hbm_to_vmem [thread:$0]  %s692_s1, 4224, %s626_s12, [#allocation6], %s605_s0, %s605_s0, %s606_s3  }
  0x23   :  { %597 = dma.done.wait [#allocation3], 32  }
  0x24   :  { %598 = vsyncadd [#allocation3], 4294967264 }
  0x25   :  { %599 = dma.done.wait [#allocation6], 4224  }
  0x26   :  { %600 = vsyncadd [#allocation6], 4294963072  ;;  %v607_v0 = vmov 0.0|0.0   ;;  %vm608_vm0 = vmmov 0   ;;  %v609_v1 = vmov 0.0   ;;  %v39_v2 = vld [vmem:[#allocation5] sm:$0xff] }
  0x27   :  { %480 = vmatprep.subr.bf16.mxu0 %v607_v0  ;;  %407 = vmatprep.mubr.msk.f32.mxu0 %vm608_vm0, %v609_v1  ;;  %v40_v3 = vld [vmem:[#allocation5 + $0x8] sm:$0xff]  ;;  %v55_v5 = vld [vmem:[#allocation5 + $0x80] sm:$0xff]  ;;  %v57_v7 = vld [vmem:[#allocation5 + $0x90] sm:$0xff]  ;;  %vm80_vm1 = vcmask 1043456   ;;  %vm76_vm2 = vcmask 162816   ;;  %vm299_vm3 = vcmask 1041408  }
  0x28   :  { %483 = vmatprep.subr.bf16.mxu1 %v607_v0  ;;  %442 = vmatprep.mubr.msk.f32.mxu1 %vm608_vm0, %v609_v1  ;;  %v481_v4 = vpack.c.bf16 %v40_v3, %v39_v2  ;;  %v56_v6 = vld [vmem:[#allocation5 + $0x88] sm:$0xff]  ;;  %v58_v8 = vld [vmem:[#allocation5 + $0x98] sm:$0xff]  ;;  %v41_v10 = vld [vmem:[#allocation5 + $0x10] sm:$0xff]  ;;  %vm304_vm4 = vcmask 1024   ;;  %s587_s18 = scalar_lea.hbm %s693_s2, 16 }
  0x29   :  { %v484_v9 = vpack.c.bf16 %v56_v6, %v55_v5  ;;  %v38_v11 = vld [vmem:[#allocation2] sm:$0x3]  ;;  %v487_v12 = vpack.c.bf16 %v58_v8, %v57_v7  ;;  %v59_v14 = vld [vmem:[#allocation5 + $0xa0] sm:$0xff]  ;;  %v60_v15 = vld [vmem:[#allocation5 + $0xa8] sm:$0xff]  ;;  %p588_p4 = scmp.ne.s32.totalorder %s693_s2, %s587_s18  ;;  %p591_p5 = scmp.lt.u32.totalorder %s587_s18, %s693_s2 }
  0x2a   :  { %482 = vmatpush3.bf16.msra.mxu0 %v481_v4  ;;  %v42_v13 = vld [vmem:[#allocation5 + $0x18] sm:$0xff]  ;;  %v490_v17 = vpack.c.bf16 %v60_v15, %v59_v14  ;;  %v61_v18 = vld [vmem:[#allocation5 + $0xb0] sm:$0xff]  ;;  %v63_v21 = vld [vmem:[#allocation5 + $0xc0] sm:$0xff] }
  0x2b   :  { %405 = vmatprep.subr.mxu0 %v609_v1  ;;  %485 = vmatpush3.bf16.msra.mxu1 %v484_v9  ;;  %v511_v16 = vpack.c.bf16 %v42_v13, %v41_v10  ;;  %v62_v19 = vld [vmem:[#allocation5 + $0xb8] sm:$0xff]  ;;  %v64_v22 = vld [vmem:[#allocation5 + $0xc8] sm:$0xff]  ;;  %v65_v24 = vld [vmem:[#allocation5 + $0xd0] sm:$0xff]  ;;  %p593_p6 = pnand %p591_p5, %p588_p4 }
  0x2c   :  { %486 = vmatprep.subr.bf16.mxu1 %v607_v0  ;;  %v493_v20 = vpack.c.bf16 %v62_v19, %v61_v18  ;;  %v496_v23 = vpack.c.bf16 %v64_v22, %v63_v21  ;;  %v66_v25 = vld [vmem:[#allocation5 + $0xd8] sm:$0xff]  ;;  %v67_v27 = vld [vmem:[#allocation5 + $0xe0] sm:$0xff]  ;;  %v68_v28 = vld [vmem:[#allocation5 + $0xe8] sm:$0xff] }
  0x2d   :  { %v499_v26 = vpack.c.bf16 %v66_v25, %v65_v24  ;;  %v502_v29 = vpack.c.bf16 %v68_v28, %v67_v27  ;;  %v69_v30 = vld [vmem:[#allocation5 + $0xf0] sm:$0xff]  ;;  %v70_v31 = vld [vmem:[#allocation5 + $0xf8] sm:$0xff]  ;;  %v43_v33 = vld [vmem:[#allocation5 + $0x20] sm:$0xff] }
  0x2e   :  { %406 = vmatpush3.msk.msra.mxu0 %vm80_vm1, %v41_v10  ;;  %v505_v32 = vpack.c.bf16 %v70_v31, %v69_v30  ;;  %v44_v34 = vld [vmem:[#allocation5 + $0x28] sm:$0xff]  ;;  %v45_v35 = vld [vmem:[#allocation5 + $0x30] sm:$0xff]  ;;  %v46_v37 = vld [vmem:[#allocation5 + $0x38] sm:$0xff] }
  0x2f   :  { %408 = vmatmul.mubr.msk.f32.vlgmr.msra.gmra.mrb[0].mxu0 %vm76_vm2, %v38_v11  ;;  %507 = vmatprep.subr.bf16.mxu0 %v607_v0  ;;  %v514_v36 = vpack.c.bf16 %v44_v34, %v43_v33  ;;  %v517_v38 = vpack.c.bf16 %v46_v37, %v45_v35  ;;  %v47_v39 = vld [vmem:[#allocation5 + $0x40] sm:$0xff]  ;;  %v48_v40 = vld [vmem:[#allocation5 + $0x48] sm:$0xff]  ;;  %v49_v42 = vld [vmem:[#allocation5 + $0x50] sm:$0xff] }
  0x30   :  { %488 = vmatpush3.bf16.msra.mxu1 %v487_v12  ;;  %509 = vmatpush3.bf16.msra.mxu0 %v481_v4  ;;  %v520_v41 = vpack.c.bf16 %v48_v40, %v47_v39  ;;  %v50_v43 = vld [vmem:[#allocation5 + $0x58] sm:$0xff]  ;;  %v51_v45 = vld [vmem:[#allocation5 + $0x60] sm:$0xff]  ;;  %v52_v46 = vld [vmem:[#allocation5 + $0x68] sm:$0xff] }
  0x31   :  { %489 = vmatprep.subr.bf16.mxu1 %v607_v0  ;;  %510 = vmatprep.subr.bf16.mxu0 %v607_v0  ;;  %v523_v44 = vpack.c.bf16 %v50_v43, %v49_v42  ;;  %v526_v47 = vpack.c.bf16 %v52_v46, %v51_v45  ;;  %v359_v48 = vld [vmem:[#allocation5 + $0x100] ss:$0 sm:$0xff]  ;;  %v53_v52 = vld [vmem:[#allocation5 + $0x70] sm:$0xff]  ;;  %v54_v53 = vld [vmem:[#allocation5 + $0x78] sm:$0xff] }
  0x32   :  { %477 = vmatprep.mubr.msk.f32.mxu0 %vm608_vm0, %v609_v1  ;;  %v529_v54 = vpack.c.bf16 %v54_v53, %v53_v52 }
  0x34   :  { %491 = vmatpush3.bf16.msra.mxu1 %v490_v17  ;;  %512 = vmatpush3.bf16.msra.mxu0 %v511_v16 }
  0x35   :  { %492 = vmatprep.subr.bf16.mxu1 %v607_v0  ;;  %513 = vmatprep.subr.bf16.mxu0 %v607_v0 }
  0x38   :  { %494 = vmatpush3.bf16.msra.mxu1 %v493_v20  ;;  %515 = vmatpush3.bf16.msra.mxu0 %v514_v36 }
  0x39   :  { %495 = vmatprep.subr.bf16.mxu1 %v607_v0  ;;  %516 = vmatprep.subr.bf16.mxu0 %v607_v0 }
  0x3c   :  { %497 = vmatpush3.bf16.msra.mxu1 %v496_v23  ;;  %518 = vmatpush3.bf16.msra.mxu0 %v517_v38 }
  0x3d   :  { %498 = vmatprep.subr.bf16.mxu1 %v607_v0  ;;  %519 = vmatprep.subr.bf16.mxu0 %v607_v0 }
  0x40   :  { %500 = vmatpush3.bf16.msra.mxu1 %v499_v26  ;;  %521 = vmatpush3.bf16.msra.mxu0 %v520_v41 }
  0x41   :  { %501 = vmatprep.subr.bf16.mxu1 %v607_v0  ;;  %522 = vmatprep.subr.bf16.mxu0 %v607_v0 }
  0x44   :  { %503 = vmatpush3.bf16.msra.mxu1 %v502_v29  ;;  %524 = vmatpush3.bf16.msra.mxu0 %v523_v44 }
  0x45   :  { %504 = vmatprep.subr.bf16.mxu1 %v607_v0  ;;  %525 = vmatprep.subr.bf16.mxu0 %v607_v0 }
  0x48   :  { %506 = vmatpush3.bf16.msra.mxu1 %v505_v32  ;;  %527 = vmatpush3.bf16.msra.mxu0 %v526_v47 }
  0x49   :  { %528 = vmatprep.subr.bf16.mxu0 %v607_v0 }
  0x4c   :  { %530 = vmatpush3.bf16.msra.mxu0 %v529_v54 }
 0x102   :  { %v150_v49 = vpop.f32.mrb[0].mxu0 }
 0x103   :  { %v151_v50 = vadd.f32 %v359_v48, %v150_v49  ;;  %v409_v51 = vpop.f32.mrb[1].mxu0 }
 0x105   :  { %443 = vmatmul.mubr.f32.vlgmr.msra.gmra.mrb[0].mxu1 %v151_v50 }
 0x1d8   :  { %v220_v55 = vpop.f32.mrb[0].mxu1 }
 0x1d9   :  { %v221_v56 = vadd.f32 1.0, %v220_v55  ;;  %v444_v57 = vpop.f32.mrb[1].mxu1 }
 0x1db   :  { %v224_v58 = vmax.f32 %v221_v56, 0.0 }
 0x1dd   :  { %478 = vmatmul.mubr.f32.vlgmr.msra.gmra.mrb[2].mxu0 %v224_v58 }
 0x2b0   :  { %v291_v59 = vpop.f32.mrb[2].mxu0 }
 0x2b1   :  { %v292_v60 = vadd.f32 %v359_v48, %v291_v59  ;;  %v479_v61 = vpop.f32.mrb[3].mxu0 }
 0x2b3   :  { %v295_v62 = vand.u32 2147483647, %v292_v60 }
 0x2b5   :  { %v297_v63 = vrot.slane %v295_v62, 6 }
 0x2b7   :  { %v300_v0 = vsel %vm299_vm3, %v292_v60, %v297_v63 }
 0x2b8   :  { %v301_v1 = vsel %vm80_vm1, %v300_v0, 0.0 }
 0x2b9   :  { %302 = vadd.xlane.f32.xlu0 %v301_v1 }
 0x346   :  { %v303_v2 = vpop.xlane.xlu0 %302 }
 0x347   :  { %v305_v3 = vsel %vm304_vm4, %v303_v2, 0.0  ;;  %v316_v4 = vrot.slane %v303_v2, 2 }
 0x348   :  { %306 = vadd.xlane.f32.xlu0 %v305_v3 }
 0x349   :  { %v318_v5 = vsel %vm304_vm4, %v316_v4, 0.0 }
 0x34a   :  { %319 = vadd.xlane.f32.xlu1 %v318_v5 }
 0x3d5   :  { %v307_v6 = vpop.xlane.xlu0 %306 }
 0x3d6   :  { %v308_v7 = vrot.slane %v307_v6, 4 }
 0x3d7   :  { %v320_v8 = vpop.xlane.xlu1 %319 }
 0x3d8   :  { %v309_v9 = vadd.f32 %v308_v7, %v307_v6  ;;  %v321_v10 = vrot.slane %v320_v8, 4 }
 0x3da   :  { %v310_v11 = vrot.slane %v309_v9, 2  ;;  %v322_v12 = vadd.f32 %v321_v10, %v320_v8 }
 0x3dc   :  { %v323_v13 = vrot.slane %v322_v12, 2  ;;  %v311_v14 = vadd.f32 %v310_v11, %v309_v9 }
 0x3de   :  { %v324_v15 = vadd.f32 %v323_v13, %v322_v12  ;;  %v312_v16 = vrot.slane %v311_v14, 1 }
 0x3e0   :  { %v313_v17 = vadd.f32 %v312_v16, %v311_v14  ;;  %v325_v18 = vrot.slane %v324_v15, 1 }
 0x3e2   :  { %531 = vpush %v313_v17  ;;  %v326_v19 = vadd.f32 %v325_v18, %v324_v15 }
 0x3e4   :  { %533 = vpush %v326_v19 }
 0x413   :  { %s532_s1 = spop %531 }
 0x415   :  { %s534_s6 = spop %533 }
 0x416   :  { %s329_s7 = sshra.s32 %s534_s6, 23  ;;  %s331_s8 = sand.u32 8388607, %s534_s6 }
 0x417   :  { %s330_s9 = sand.u32 255, %s329_s7  ;;  %p333_p2 = scmp.ne.s32.totalorder %s331_s8, 0 }
 0x418   :  { %s362_s11 = sadd.s32 4294967169, %s330_s9  ;;  %p336_p3 = scmp.gt.f32.partialorder %s534_s6, 1.0 }
 0x419   :  { %s334_s10 = scalar_select %p333_p2, 1, 0 }
 0x41b   :  { %s335_s12 = sadd.s32 %s362_s11, %s334_s10 }
 0x41c   :  { %s695_s12 = smov (!%p336_p3, %s335_s12), 0 }
 0x41d   :  { %s338_s13 = ssub.s32 127, %s695_s12 }
 0x41e   :  { %s339_s14 = sshll.u32 %s338_s13, 23 }
 0x41f   :  { %s341_s15 = smul.f32 %s532_s1, %s339_s14 }
 0x421   :  { %343 = sst [smem:[#allocation7]] %s341_s15 }
 0x422   :  { %596 = shalt.err (!%p593_p6)
}
 0x423   :  { %s610_s23 = smov [#allocation7]  }
 0x424   :  { %351 = dma.smem_to_hbm %s610_s23, 16, %s693_s2, [#allocation4]  }
 0x425   :  { %601 = dma.done.wait [#allocation4], 16  }
 0x426   :  { %602 = vsyncadd [#allocation4], 4294967280 }
 0x427   :  { %355 = sfence }
 0x428   :  { %356 = vsyncpa [#allocation3], 1 }
 0x429   :  { %357 = vsyncpa [#allocation6], 1 }
 0x42a   :  { %358 = vsyncpa [#allocation4], 1 }

</bundles_post_ra>
